<compile_context>
chip_gen: v7x
topology: tpu7x:2x2x1
jax: 0.10.0
libtpu: 0.0.40
codegen_flags: <defaults>
</compile_context>

<pallas_src>
import functools

import jax
import jax.numpy as jnp
from jax.experimental import pallas as pl
from jax.experimental.pallas import tpu as pltpu


def _tv2d_kernel(beta_ref, x_ref, o_ref, *, lam, n_iters, img_h, unroll=8):
    """Accelerated dual projected-gradient (FGP) solver for the 2D aniso-TV prox.

    minimizes  0.5 * ||Y - X||^2 + lam * ( sum|D_h Y| + sum|D_v Y| )
    via  Y = X - (D_h^T p_h + D_v^T p_v),  p clipped to [-lam, lam].

    The block may hold several independent images stacked along the sublane axis
    (block rows = pack * img_h); per-image boundaries are enforced purely through
    the step-scaled masks.
    """
    PH, W = x_ref.shape
    w = x_ref[...].astype(jnp.float32)

    # Loop-invariant, step-scaled boundary masks (hoisted out of the iteration
    # loop; the 1/L = 0.125 gradient step is folded in so the dual update needs
    # no separate multiply).
    col = jax.lax.broadcasted_iota(jnp.int32, (PH, W), 1)
    row = jax.lax.broadcasted_iota(jnp.int32, (PH, W), 0)
    step = jnp.float32(0.125)  # 1 / ||[D_h; D_v]||^2  (operator norm squared <= 8)
    smask_h = jnp.where(col < W - 1, step, jnp.float32(0.0))                # zero last column
    smask_v = jnp.where(row % img_h < img_h - 1, step, jnp.float32(0.0))    # zero last row of each image

    # Step-scaled masked forward differences (applied to the primal iterate).
    # pltpu.roll follows jnp.roll semantics: roll(x, W-1, axis=1)[..., j] == x[..., (j+1) % W].
    def grad_h(x):
        return smask_h * (pltpu.roll(x, shift=W - 1, axis=1) - x)

    def grad_v(x):
        return smask_v * (pltpu.roll(x, shift=PH - 1, axis=0) - x)

    # Adjoints (negative divergence).  The value the roll wraps into column 0 /
    # each image's first row is the dual's last column / previous image's last
    # row, which stays *exactly* zero by induction in f32 (init 0, masked
    # gradient, clip and momentum preserve 0), so no select/compare is needed.
    # NOTE: this invariant silently breaks if the carries are cast to bf16 or the
    # masks are refactored -- keep the dual carries in f32.
    def dht(p):
        return pltpu.roll(p, shift=1, axis=1) - p

    def dvt(p):
        return pltpu.roll(p, shift=1, axis=0) - p

    def body(k, carry):
        ph, pv, rh, rv = carry
        x_cur = w - (dht(rh) + dvt(rv))
        ph_n = jnp.clip(rh + grad_h(x_cur), -lam, lam)
        pv_n = jnp.clip(rv + grad_v(x_cur), -lam, lam)
        beta = beta_ref[k]                      # Nesterov k/(k+3), SMEM scalar read
        rh_n = ph_n + beta * (ph_n - ph)
        rv_n = pv_n + beta * (pv_n - pv)
        return ph_n, pv_n, rh_n, rv_n

    def unrolled_body(o, carry):
        k0 = o * unroll
        for u in range(unroll):
            carry = body(k0 + u, carry)
        return carry

    z = jnp.zeros((PH, W), jnp.float32)
    carry = (z, z, z, z)                        # (p_h, p_v, r_h, r_v) loop carries
    n_main = (n_iters // unroll) * unroll
    if n_main > 0:
        carry = jax.lax.fori_loop(0, n_iters // unroll, unrolled_body, carry)
    if n_main < n_iters:                        # remainder loop only if needed
        carry = jax.lax.fori_loop(n_main, n_iters, body, carry)
    ph, pv, _, _ = carry

    # TODO(synk): tol-based early exit (convergence check every ~64 iters) not
    #             implemented; fixed iteration count keeps the kernel deterministic.
    o_ref[...] = (w - (dht(ph) + dvt(pv))).astype(o_ref.dtype)


def _pick_pack(batch):
    """Images stacked per block: fill the sublane axis / VALU slots, but keep at
    least two grid blocks when possible so v7x's second TensorCore gets work."""
    for p in (8, 4, 2, 1):
        if batch % p == 0 and batch // p >= 2:
            return p
    for p in (8, 4, 2):
        if batch % p == 0:
            return p
    return 1


def tv2d_batched(x, alpha=0.1, max_iter=1000, tol=1e-12, images_per_block=None):
    """Solve the TV2D prox independently for each image in x of shape (B, H, W)."""
    del tol  # TODO(synk): tol-based early stopping not implemented in-kernel.
    B, H, W = x.shape
    pack = _pick_pack(B) if images_per_block is None else int(images_per_block)
    if B % pack != 0:
        raise ValueError(f"batch {B} not divisible by images_per_block {pack}")
    nblocks = B // pack
    lam = float(alpha) / 2.0    # prox_tv2d is called with step_size = alpha / 2
    n_iters = int(max_iter)

    # Pack `pack` images along the sublane axis of each block.
    xr = x.reshape(nblocks, pack * H, W)

    # Nesterov momentum table, read as SMEM scalars inside the kernel.
    ks = jnp.arange(max(n_iters, 1), dtype=jnp.float32)
    beta = ks / (ks + 3.0)

    kernel = functools.partial(_tv2d_kernel, lam=lam, n_iters=n_iters, img_h=H)

    # VMEM budget: ~a dozen live (pack*H, W) f32 arrays + double-buffered I/O.
    blk_bytes = pack * H * W * 4
    est_bytes = 18 * blk_bytes + (2 << 20)
    vmem_limit = int(min(est_bytes, 64 << 20)) if est_bytes > (16 << 20) else None

    out = pl.pallas_call(
        kernel,
        out_shape=jax.ShapeDtypeStruct((nblocks, pack * H, W), x.dtype),
        grid=(nblocks,),
        in_specs=[
            pl.BlockSpec(memory_space=pltpu.MemorySpace.SMEM),       # beta table
            pl.BlockSpec((None, pack * H, W), lambda b: (b, 0, 0)),  # image block
        ],
        out_specs=pl.BlockSpec((None, pack * H, W), lambda b: (b, 0, 0)),
        compiler_params=pltpu.CompilerParams(
            dimension_semantics=("parallel",),
            vmem_limit_bytes=vmem_limit,
        ),
    )(beta, xr)
    return out.reshape(B, H, W)


def tv2d(x, alpha=0.1, max_iter=1000, tol=1e-12):
    """JAX/Pallas equivalent of TV2D(alpha, max_iter, tol).forward(x) for 2D x."""
    return tv2d_batched(x[None], alpha, max_iter, tol, images_per_block=1)[0]


def _tv2d_ref(x, alpha=0.1, max_iter=1000):
    """Pure-JAX reference of the same FGP iteration (slicing/padding, no rolls)."""
    lam = alpha / 2.0
    w = x.astype(jnp.float32)
    H, W = x.shape

    def dh(z):
        return jnp.pad(z[:, 1:] - z[:, :-1], ((0, 0), (0, 1)))

    def dv(z):
        return jnp.pad(z[1:, :] - z[:-1, :], ((0, 1), (0, 0)))

    def dht(p):
        return jnp.pad(p[:, :-1], ((0, 0), (1, 0))) - p

    def dvt(p):
        return jnp.pad(p[:-1, :], ((1, 0), (0, 0))) - p

    step = 0.125
    z = jnp.zeros((H, W), jnp.float32)

    def body(k, carry):
        ph, pv, rh, rv = carry
        x_cur = w - (dht(rh) + dvt(rv))
        ph_n = jnp.clip(rh + step * dh(x_cur), -lam, lam)
        pv_n = jnp.clip(rv + step * dv(x_cur), -lam, lam)
        kf = jnp.asarray(k, jnp.float32)
        beta = kf / (kf + 3.0)
        return (ph_n, pv_n, ph_n + beta * (ph_n - ph), pv_n + beta * (pv_n - pv))

    ph, pv, _, _ = jax.lax.fori_loop(0, max_iter, body, (z, z, z, z))
    return (w - (dht(ph) + dvt(pv))).astype(x.dtype)


def _tv_aniso(y):
    """Anisotropic TV value (cheap sanity check only)."""
    return (jnp.abs(y[:, 1:] - y[:, :-1]).sum() +
            jnp.abs(y[1:, :] - y[:-1, :]).sum())


if __name__ == "__main__":
    alpha, max_iter, tol = 0.1, 1000, 1e-12  # TV2D() defaults
    key = jax.random.PRNGKey(0)
    k_single, k_batch = jax.random.split(key)

    # --- single 2-D image: exact analogue of TV2D.forward(X) -----------------
    H, W = 16, 128   # W multiple of 128 keeps the lane axis dense
    X = jax.random.normal(k_single, (H, W), dtype=jnp.float32)
    Y = jax.block_until_ready(tv2d(X, alpha=alpha, max_iter=max_iter, tol=tol))

    assert Y.shape == X.shape and Y.dtype == X.dtype
    assert bool(jnp.all(jnp.isfinite(Y)))

    # Validate the kernel against the pure-JAX reference of the same dual solver
    # (catches roll-direction / adjoint / boundary-mask mistakes).
    Y_ref = jax.block_until_ready(
        jax.jit(functools.partial(_tv2d_ref, alpha=alpha, max_iter=max_iter))(X))
    assert float(jnp.max(jnp.abs(Y - Y_ref))) < 1e-3

    # The TV prox must not increase the total variation of its input.
    assert float(_tv_aniso(Y)) <= float(_tv_aniso(X)) + 1e-3

    # --- batched path: sublane-packed images + parallel grid over blocks -----
    B = 8
    Xb = jax.random.normal(k_batch, (B, H, W), dtype=jnp.float32)
    Yb = jax.block_until_ready(
        tv2d_batched(Xb, alpha=alpha, max_iter=max_iter, tol=tol))
    Yb_ref = jax.block_until_ready(
        jax.jit(jax.vmap(functools.partial(_tv2d_ref, alpha=alpha,
                                           max_iter=max_iter)))(Xb))
    assert Yb.shape == Xb.shape and Yb.dtype == Xb.dtype
    assert float(jnp.max(jnp.abs(Yb - Yb_ref))) < 1e-3

    print("KERNEL_OK")
</pallas_src>

<mosaic_0001>
module attributes {stable_mosaic.version = 11 : i64} {
  func.func @_tv2d_kernel(%arg0: i32, %arg1: memref<1000xf32, #tpu.memory_space<smem>>, %arg2: memref<1x16x128xf32, #tpu.memory_space<vmem>>, %arg3: memref<1x16x128xf32, #tpu.memory_space<vmem>>) attributes {dimension_semantics = [#tpu.dimension_semantics<parallel>], iteration_bounds = array<i64: 1>, scalar_prefetch = 0 : i64, scratch_operands = 0 : i64, tpu.core_type = #tpu.core_type<tc>, window_params = [{transform_indices = @transform_0, window_bounds = array<i64: 1000>}, {transform_indices = @transform_1, window_bounds = array<i64: 1, 16, 128>}, {transform_indices = @transform_2, window_bounds = array<i64: 1, 16, 128>}]} {
    %c0 = arith.constant 0 : index
    %c0_0 = arith.constant 0 : index
    %c0_1 = arith.constant 0 : index
    %0 = vector.load %arg2[%c0, %c0_0, %c0_1] : memref<1x16x128xf32, #tpu.memory_space<vmem>>, vector<1x16x128xf32>
    %1 = vector.shape_cast %0 : vector<1x16x128xf32> to vector<16x128xf32>
    %2 = tpu.iota {dimensions = array<i32: 1>} : vector<16x128xi32>
    %3 = tpu.iota {dimensions = array<i32: 0>} : vector<16x128xi32>
    %c127_i32 = arith.constant 127 : i32
    %4 = vector.broadcast %c127_i32 : i32 to vector<16x128xi32>
    %5 = arith.cmpi slt, %2, %4 : vector<16x128xi32>
    %cst = arith.constant 1.250000e-01 : f32
    %cst_2 = arith.constant 0.000000e+00 : f32
    %6 = vector.broadcast %cst : f32 to vector<16x128xf32>
    %7 = vector.broadcast %cst_2 : f32 to vector<16x128xf32>
    %8 = arith.select %5, %6, %7 : vector<16x128xi1>, vector<16x128xf32>
    %c16_i32 = arith.constant 16 : i32
    %c0_i32 = arith.constant 0 : i32
    %9 = arith.cmpi eq, %c16_i32, %c0_i32 : i32
    %c1_i32 = arith.constant 1 : i32
    %10 = arith.select %9, %c1_i32, %c16_i32 : i32
    %11 = vector.broadcast %10 : i32 to vector<16x128xi32>
    %12 = arith.remsi %3, %11 : vector<16x128xi32>
    %c0_i32_3 = arith.constant 0 : i32
    %13 = vector.broadcast %c0_i32_3 : i32 to vector<16x128xi32>
    %14 = arith.cmpi ne, %12, %13 : vector<16x128xi32>
    %c0_i32_4 = arith.constant 0 : i32
    %15 = vector.broadcast %c0_i32_4 : i32 to vector<16x128xi32>
    %16 = arith.cmpi slt, %12, %15 : vector<16x128xi32>
    %c0_i32_5 = arith.constant 0 : i32
    %17 = arith.cmpi slt, %10, %c0_i32_5 : i32
    %18 = vector.broadcast %17 : i1 to vector<16x128xi1>
    %19 = vector.broadcast %18 : vector<16x128xi1> to vector<16x128xi1>
    %20 = arith.xori %16, %19 : vector<16x128xi1>
    %21 = arith.andi %20, %14 : vector<16x128xi1>
    %22 = vector.broadcast %10 : i32 to vector<16x128xi32>
    %23 = arith.addi %12, %22 : vector<16x128xi32>
    %24 = arith.select %21, %23, %12 : vector<16x128xi1>, vector<16x128xi32>
    %c15_i32 = arith.constant 15 : i32
    %25 = vector.broadcast %c15_i32 : i32 to vector<16x128xi32>
    %26 = arith.cmpi slt, %24, %25 : vector<16x128xi32>
    %cst_6 = arith.constant 1.250000e-01 : f32
    %cst_7 = arith.constant 0.000000e+00 : f32
    %27 = vector.broadcast %cst_6 : f32 to vector<16x128xf32>
    %28 = vector.broadcast %cst_7 : f32 to vector<16x128xf32>
    %29 = arith.select %26, %27, %28 : vector<16x128xi1>, vector<16x128xf32>
    %cst_8 = arith.constant 0.000000e+00 : f32
    %30 = vector.broadcast %cst_8 : f32 to vector<16x128xf32>
    %c0_i32_9 = arith.constant 0 : i32
    %c125_i32 = arith.constant 125 : i32
    %31 = arith.addi %c0_i32_9, %c125_i32 : i32
    %c1_i32_10 = arith.constant 1 : i32
    %32:4 = scf.for %arg4 = %c0_i32_9 to %31 step %c1_i32_10 iter_args(%arg5 = %30, %arg6 = %30, %arg7 = %30, %arg8 = %30) -> (vector<16x128xf32>, vector<16x128xf32>, vector<16x128xf32>, vector<16x128xf32>)  : i32 {
      %c8_i32 = arith.constant 8 : i32
      %42 = arith.muli %arg4, %c8_i32 : i32
      %c0_i32_17 = arith.constant 0 : i32
      %43 = arith.addi %42, %c0_i32_17 : i32
      %c1_i32_18 = arith.constant 1 : i32
      %44 = tpu.dynamic_rotate %arg7 by %c1_i32_18 dim 1 : vector<16x128xf32>, i32 -> vector<16x128xf32>
      %45 = arith.subf %44, %arg7 : vector<16x128xf32>
      %c1_i32_19 = arith.constant 1 : i32
      %46 = tpu.dynamic_rotate %arg8 by %c1_i32_19 dim 0 : vector<16x128xf32>, i32 -> vector<16x128xf32>
      %47 = arith.subf %46, %arg8 : vector<16x128xf32>
      %48 = arith.addf %45, %47 : vector<16x128xf32>
      %49 = arith.subf %1, %48 : vector<16x128xf32>
      %c127_i32_20 = arith.constant 127 : i32
      %50 = tpu.dynamic_rotate %49 by %c127_i32_20 dim 1 : vector<16x128xf32>, i32 -> vector<16x128xf32>
      %51 = arith.subf %50, %49 : vector<16x128xf32>
      %52 = arith.mulf %8, %51 : vector<16x128xf32>
      %53 = arith.addf %arg7, %52 : vector<16x128xf32>
      %cst_21 = arith.constant -5.000000e-02 : f32
      %cst_22 = arith.constant 5.000000e-02 : f32
      %54 = vector.broadcast %cst_21 : f32 to vector<16x128xf32>
      %55 = arith.maximumf %54, %53 : vector<16x128xf32>
      %56 = vector.broadcast %cst_22 : f32 to vector<16x128xf32>
      %57 = arith.minimumf %56, %55 : vector<16x128xf32>
      %c15_i32_23 = arith.constant 15 : i32
      %58 = tpu.dynamic_rotate %49 by %c15_i32_23 dim 0 : vector<16x128xf32>, i32 -> vector<16x128xf32>
      %59 = arith.subf %58, %49 : vector<16x128xf32>
      %60 = arith.mulf %29, %59 : vector<16x128xf32>
      %61 = arith.addf %arg8, %60 : vector<16x128xf32>
      %cst_24 = arith.constant -5.000000e-02 : f32
      %cst_25 = arith.constant 5.000000e-02 : f32
      %62 = vector.broadcast %cst_24 : f32 to vector<16x128xf32>
      %63 = arith.maximumf %62, %61 : vector<16x128xf32>
      %64 = vector.broadcast %cst_25 : f32 to vector<16x128xf32>
      %65 = arith.minimumf %64, %63 : vector<16x128xf32>
      %66 = arith.index_cast %43 : i32 to index
      %67 = memref.load %arg1[%66] : memref<1000xf32, #tpu.memory_space<smem>>
      %68 = arith.subf %57, %arg5 : vector<16x128xf32>
      %69 = vector.broadcast %67 : f32 to vector<16x128xf32>
      %70 = arith.mulf %69, %68 : vector<16x128xf32>
      %71 = arith.addf %57, %70 : vector<16x128xf32>
      %72 = arith.subf %65, %arg6 : vector<16x128xf32>
      %73 = vector.broadcast %67 : f32 to vector<16x128xf32>
      %74 = arith.mulf %73, %72 : vector<16x128xf32>
      %75 = arith.addf %65, %74 : vector<16x128xf32>
      %c1_i32_26 = arith.constant 1 : i32
      %76 = arith.addi %42, %c1_i32_26 : i32
      %c1_i32_27 = arith.constant 1 : i32
      %77 = tpu.dynamic_rotate %71 by %c1_i32_27 dim 1 : vector<16x128xf32>, i32 -> vector<16x128xf32>
      %78 = arith.subf %77, %71 : vector<16x128xf32>
      %c1_i32_28 = arith.constant 1 : i32
      %79 = tpu.dynamic_rotate %75 by %c1_i32_28 dim 0 : vector<16x128xf32>, i32 -> vector<16x128xf32>
      %80 = arith.subf %79, %75 : vector<16x128xf32>
      %81 = arith.addf %78, %80 : vector<16x128xf32>
      %82 = arith.subf %1, %81 : vector<16x128xf32>
      %c127_i32_29 = arith.constant 127 : i32
      %83 = tpu.dynamic_rotate %82 by %c127_i32_29 dim 1 : vector<16x128xf32>, i32 -> vector<16x128xf32>
      %84 = arith.subf %83, %82 : vector<16x128xf32>
      %85 = arith.mulf %8, %84 : vector<16x128xf32>
      %86 = arith.addf %71, %85 : vector<16x128xf32>
      %cst_30 = arith.constant -5.000000e-02 : f32
      %cst_31 = arith.constant 5.000000e-02 : f32
      %87 = vector.broadcast %cst_30 : f32 to vector<16x128xf32>
      %88 = arith.maximumf %87, %86 : vector<16x128xf32>
      %89 = vector.broadcast %cst_31 : f32 to vector<16x128xf32>
      %90 = arith.minimumf %89, %88 : vector<16x128xf32>
      %c15_i32_32 = arith.constant 15 : i32
      %91 = tpu.dynamic_rotate %82 by %c15_i32_32 dim 0 : vector<16x128xf32>, i32 -> vector<16x128xf32>
      %92 = arith.subf %91, %82 : vector<16x128xf32>
      %93 = arith.mulf %29, %92 : vector<16x128xf32>
      %94 = arith.addf %75, %93 : vector<16x128xf32>
      %cst_33 = arith.constant -5.000000e-02 : f32
      %cst_34 = arith.constant 5.000000e-02 : f32
      %95 = vector.broadcast %cst_33 : f32 to vector<16x128xf32>
      %96 = arith.maximumf %95, %94 : vector<16x128xf32>
      %97 = vector.broadcast %cst_34 : f32 to vector<16x128xf32>
      %98 = arith.minimumf %97, %96 : vector<16x128xf32>
      %99 = arith.index_cast %76 : i32 to index
      %100 = memref.load %arg1[%99] : memref<1000xf32, #tpu.memory_space<smem>>
      %101 = arith.subf %90, %57 : vector<16x128xf32>
      %102 = vector.broadcast %100 : f32 to vector<16x128xf32>
      %103 = arith.mulf %102, %101 : vector<16x128xf32>
      %104 = arith.addf %90, %103 : vector<16x128xf32>
      %105 = arith.subf %98, %65 : vector<16x128xf32>
      %106 = vector.broadcast %100 : f32 to vector<16x128xf32>
      %107 = arith.mulf %106, %105 : vector<16x128xf32>
      %108 = arith.addf %98, %107 : vector<16x128xf32>
      %c2_i32 = arith.constant 2 : i32
      %109 = arith.addi %42, %c2_i32 : i32
      %c1_i32_35 = arith.constant 1 : i32
      %110 = tpu.dynamic_rotate %104 by %c1_i32_35 dim 1 : vector<16x128xf32>, i32 -> vector<16x128xf32>
      %111 = arith.subf %110, %104 : vector<16x128xf32>
      %c1_i32_36 = arith.constant 1 : i32
      %112 = tpu.dynamic_rotate %108 by %c1_i32_36 dim 0 : vector<16x128xf32>, i32 -> vector<16x128xf32>
      %113 = arith.subf %112, %108 : vector<16x128xf32>
      %114 = arith.addf %111, %113 : vector<16x128xf32>
      %115 = arith.subf %1, %114 : vector<16x128xf32>
      %c127_i32_37 = arith.constant 127 : i32
      %116 = tpu.dynamic_rotate %115 by %c127_i32_37 dim 1 : vector<16x128xf32>, i32 -> vector<16x128xf32>
      %117 = arith.subf %116, %115 : vector<16x128xf32>
      %118 = arith.mulf %8, %117 : vector<16x128xf32>
      %119 = arith.addf %104, %118 : vector<16x128xf32>
      %cst_38 = arith.constant -5.000000e-02 : f32
      %cst_39 = arith.constant 5.000000e-02 : f32
      %120 = vector.broadcast %cst_38 : f32 to vector<16x128xf32>
      %121 = arith.maximumf %120, %119 : vector<16x128xf32>
      %122 = vector.broadcast %cst_39 : f32 to vector<16x128xf32>
      %123 = arith.minimumf %122, %121 : vector<16x128xf32>
      %c15_i32_40 = arith.constant 15 : i32
      %124 = tpu.dynamic_rotate %115 by %c15_i32_40 dim 0 : vector<16x128xf32>, i32 -> vector<16x128xf32>
      %125 = arith.subf %124, %115 : vector<16x128xf32>
      %126 = arith.mulf %29, %125 : vector<16x128xf32>
      %127 = arith.addf %108, %126 : vector<16x128xf32>
      %cst_41 = arith.constant -5.000000e-02 : f32
      %cst_42 = arith.constant 5.000000e-02 : f32
      %128 = vector.broadcast %cst_41 : f32 to vector<16x128xf32>
      %129 = arith.maximumf %128, %127 : vector<16x128xf32>
      %130 = vector.broadcast %cst_42 : f32 to vector<16x128xf32>
      %131 = arith.minimumf %130, %129 : vector<16x128xf32>
      %132 = arith.index_cast %109 : i32 to index
      %133 = memref.load %arg1[%132] : memref<1000xf32, #tpu.memory_space<smem>>
      %134 = arith.subf %123, %90 : vector<16x128xf32>
      %135 = vector.broadcast %133 : f32 to vector<16x128xf32>
      %136 = arith.mulf %135, %134 : vector<16x128xf32>
      %137 = arith.addf %123, %136 : vector<16x128xf32>
      %138 = arith.subf %131, %98 : vector<16x128xf32>
      %139 = vector.broadcast %133 : f32 to vector<16x128xf32>
      %140 = arith.mulf %139, %138 : vector<16x128xf32>
      %141 = arith.addf %131, %140 : vector<16x128xf32>
      %c3_i32 = arith.constant 3 : i32
      %142 = arith.addi %42, %c3_i32 : i32
      %c1_i32_43 = arith.constant 1 : i32
      %143 = tpu.dynamic_rotate %137 by %c1_i32_43 dim 1 : vector<16x128xf32>, i32 -> vector<16x128xf32>
      %144 = arith.subf %143, %137 : vector<16x128xf32>
      %c1_i32_44 = arith.constant 1 : i32
      %145 = tpu.dynamic_rotate %141 by %c1_i32_44 dim 0 : vector<16x128xf32>, i32 -> vector<16x128xf32>
      %146 = arith.subf %145, %141 : vector<16x128xf32>
      %147 = arith.addf %144, %146 : vector<16x128xf32>
      %148 = arith.subf %1, %147 : vector<16x128xf32>
      %c127_i32_45 = arith.constant 127 : i32
      %149 = tpu.dynamic_rotate %148 by %c127_i32_45 dim 1 : vector<16x128xf32>, i32 -> vector<16x128xf32>
      %150 = arith.subf %149, %148 : vector<16x128xf32>
      %151 = arith.mulf %8, %150 : vector<16x128xf32>
      %152 = arith.addf %137, %151 : vector<16x128xf32>
      %cst_46 = arith.constant -5.000000e-02 : f32
      %cst_47 = arith.constant 5.000000e-02 : f32
      %153 = vector.broadcast %cst_46 : f32 to vector<16x128xf32>
      %154 = arith.maximumf %153, %152 : vector<16x128xf32>
      %155 = vector.broadcast %cst_47 : f32 to vector<16x128xf32>
      %156 = arith.minimumf %155, %154 : vector<16x128xf32>
      %c15_i32_48 = arith.constant 15 : i32
      %157 = tpu.dynamic_rotate %148 by %c15_i32_48 dim 0 : vector<16x128xf32>, i32 -> vector<16x128xf32>
      %158 = arith.subf %157, %148 : vector<16x128xf32>
      %159 = arith.mulf %29, %158 : vector<16x128xf32>
      %160 = arith.addf %141, %159 : vector<16x128xf32>
      %cst_49 = arith.constant -5.000000e-02 : f32
      %cst_50 = arith.constant 5.000000e-02 : f32
      %161 = vector.broadcast %cst_49 : f32 to vector<16x128xf32>
      %162 = arith.maximumf %161, %160 : vector<16x128xf32>
      %163 = vector.broadcast %cst_50 : f32 to vector<16x128xf32>
      %164 = arith.minimumf %163, %162 : vector<16x128xf32>
      %165 = arith.index_cast %142 : i32 to index
      %166 = memref.load %arg1[%165] : memref<1000xf32, #tpu.memory_space<smem>>
      %167 = arith.subf %156, %123 : vector<16x128xf32>
      %168 = vector.broadcast %166 : f32 to vector<16x128xf32>
      %169 = arith.mulf %168, %167 : vector<16x128xf32>
      %170 = arith.addf %156, %169 : vector<16x128xf32>
      %171 = arith.subf %164, %131 : vector<16x128xf32>
      %172 = vector.broadcast %166 : f32 to vector<16x128xf32>
      %173 = arith.mulf %172, %171 : vector<16x128xf32>
      %174 = arith.addf %164, %173 : vector<16x128xf32>
      %c4_i32 = arith.constant 4 : i32
      %175 = arith.addi %42, %c4_i32 : i32
      %c1_i32_51 = arith.constant 1 : i32
      %176 = tpu.dynamic_rotate %170 by %c1_i32_51 dim 1 : vector<16x128xf32>, i32 -> vector<16x128xf32>
      %177 = arith.subf %176, %170 : vector<16x128xf32>
      %c1_i32_52 = arith.constant 1 : i32
      %178 = tpu.dynamic_rotate %174 by %c1_i32_52 dim 0 : vector<16x128xf32>, i32 -> vector<16x128xf32>
      %179 = arith.subf %178, %174 : vector<16x128xf32>
      %180 = arith.addf %177, %179 : vector<16x128xf32>
      %181 = arith.subf %1, %180 : vector<16x128xf32>
      %c127_i32_53 = arith.constant 127 : i32
      %182 = tpu.dynamic_rotate %181 by %c127_i32_53 dim 1 : vector<16x128xf32>, i32 -> vector<16x128xf32>
      %183 = arith.subf %182, %181 : vector<16x128xf32>
      %184 = arith.mulf %8, %183 : vector<16x128xf32>
      %185 = arith.addf %170, %184 : vector<16x128xf32>
      %cst_54 = arith.constant -5.000000e-02 : f32
      %cst_55 = arith.constant 5.000000e-02 : f32
      %186 = vector.broadcast %cst_54 : f32 to vector<16x128xf32>
      %187 = arith.maximumf %186, %185 : vector<16x128xf32>
      %188 = vector.broadcast %cst_55 : f32 to vector<16x128xf32>
      %189 = arith.minimumf %188, %187 : vector<16x128xf32>
      %c15_i32_56 = arith.constant 15 : i32
      %190 = tpu.dynamic_rotate %181 by %c15_i32_56 dim 0 : vector<16x128xf32>, i32 -> vector<16x128xf32>
      %191 = arith.subf %190, %181 : vector<16x128xf32>
      %192 = arith.mulf %29, %191 : vector<16x128xf32>
      %193 = arith.addf %174, %192 : vector<16x128xf32>
      %cst_57 = arith.constant -5.000000e-02 : f32
      %cst_58 = arith.constant 5.000000e-02 : f32
      %194 = vector.broadcast %cst_57 : f32 to vector<16x128xf32>
      %195 = arith.maximumf %194, %193 : vector<16x128xf32>
      %196 = vector.broadcast %cst_58 : f32 to vector<16x128xf32>
      %197 = arith.minimumf %196, %195 : vector<16x128xf32>
      %198 = arith.index_cast %175 : i32 to index
      %199 = memref.load %arg1[%198] : memref<1000xf32, #tpu.memory_space<smem>>
      %200 = arith.subf %189, %156 : vector<16x128xf32>
      %201 = vector.broadcast %199 : f32 to vector<16x128xf32>
      %202 = arith.mulf %201, %200 : vector<16x128xf32>
      %203 = arith.addf %189, %202 : vector<16x128xf32>
      %204 = arith.subf %197, %164 : vector<16x128xf32>
      %205 = vector.broadcast %199 : f32 to vector<16x128xf32>
      %206 = arith.mulf %205, %204 : vector<16x128xf32>
      %207 = arith.addf %197, %206 : vector<16x128xf32>
      %c5_i32 = arith.constant 5 : i32
      %208 = arith.addi %42, %c5_i32 : i32
      %c1_i32_59 = arith.constant 1 : i32
      %209 = tpu.dynamic_rotate %203 by %c1_i32_59 dim 1 : vector<16x128xf32>, i32 -> vector<16x128xf32>
      %210 = arith.subf %209, %203 : vector<16x128xf32>
      %c1_i32_60 = arith.constant 1 : i32
      %211 = tpu.dynamic_rotate %207 by %c1_i32_60 dim 0 : vector<16x128xf32>, i32 -> vector<16x128xf32>
      %212 = arith.subf %211, %207 : vector<16x128xf32>
      %213 = arith.addf %210, %212 : vector<16x128xf32>
      %214 = arith.subf %1, %213 : vector<16x128xf32>
      %c127_i32_61 = arith.constant 127 : i32
      %215 = tpu.dynamic_rotate %214 by %c127_i32_61 dim 1 : vector<16x128xf32>, i32 -> vector<16x128xf32>
      %216 = arith.subf %215, %214 : vector<16x128xf32>
      %217 = arith.mulf %8, %216 : vector<16x128xf32>
      %218 = arith.addf %203, %217 : vector<16x128xf32>
      %cst_62 = arith.constant -5.000000e-02 : f32
      %cst_63 = arith.constant 5.000000e-02 : f32
      %219 = vector.broadcast %cst_62 : f32 to vector<16x128xf32>
      %220 = arith.maximumf %219, %218 : vector<16x128xf32>
      %221 = vector.broadcast %cst_63 : f32 to vector<16x128xf32>
      %222 = arith.minimumf %221, %220 : vector<16x128xf32>
      %c15_i32_64 = arith.constant 15 : i32
      %223 = tpu.dynamic_rotate %214 by %c15_i32_64 dim 0 : vector<16x128xf32>, i32 -> vector<16x128xf32>
      %224 = arith.subf %223, %214 : vector<16x128xf32>
      %225 = arith.mulf %29, %224 : vector<16x128xf32>
      %226 = arith.addf %207, %225 : vector<16x128xf32>
      %cst_65 = arith.constant -5.000000e-02 : f32
      %cst_66 = arith.constant 5.000000e-02 : f32
      %227 = vector.broadcast %cst_65 : f32 to vector<16x128xf32>
      %228 = arith.maximumf %227, %226 : vector<16x128xf32>
      %229 = vector.broadcast %cst_66 : f32 to vector<16x128xf32>
      %230 = arith.minimumf %229, %228 : vector<16x128xf32>
      %231 = arith.index_cast %208 : i32 to index
      %232 = memref.load %arg1[%231] : memref<1000xf32, #tpu.memory_space<smem>>
      %233 = arith.subf %222, %189 : vector<16x128xf32>
      %234 = vector.broadcast %232 : f32 to vector<16x128xf32>
      %235 = arith.mulf %234, %233 : vector<16x128xf32>
      %236 = arith.addf %222, %235 : vector<16x128xf32>
      %237 = arith.subf %230, %197 : vector<16x128xf32>
      %238 = vector.broadcast %232 : f32 to vector<16x128xf32>
      %239 = arith.mulf %238, %237 : vector<16x128xf32>
      %240 = arith.addf %230, %239 : vector<16x128xf32>
      %c6_i32 = arith.constant 6 : i32
      %241 = arith.addi %42, %c6_i32 : i32
      %c1_i32_67 = arith.constant 1 : i32
      %242 = tpu.dynamic_rotate %236 by %c1_i32_67 dim 1 : vector<16x128xf32>, i32 -> vector<16x128xf32>
      %243 = arith.subf %242, %236 : vector<16x128xf32>
      %c1_i32_68 = arith.constant 1 : i32
      %244 = tpu.dynamic_rotate %240 by %c1_i32_68 dim 0 : vector<16x128xf32>, i32 -> vector<16x128xf32>
      %245 = arith.subf %244, %240 : vector<16x128xf32>
      %246 = arith.addf %243, %245 : vector<16x128xf32>
      %247 = arith.subf %1, %246 : vector<16x128xf32>
      %c127_i32_69 = arith.constant 127 : i32
      %248 = tpu.dynamic_rotate %247 by %c127_i32_69 dim 1 : vector<16x128xf32>, i32 -> vector<16x128xf32>
      %249 = arith.subf %248, %247 : vector<16x128xf32>
      %250 = arith.mulf %8, %249 : vector<16x128xf32>
      %251 = arith.addf %236, %250 : vector<16x128xf32>
      %cst_70 = arith.constant -5.000000e-02 : f32
      %cst_71 = arith.constant 5.000000e-02 : f32
      %252 = vector.broadcast %cst_70 : f32 to vector<16x128xf32>
      %253 = arith.maximumf %252, %251 : vector<16x128xf32>
      %254 = vector.broadcast %cst_71 : f32 to vector<16x128xf32>
      %255 = arith.minimumf %254, %253 : vector<16x128xf32>
      %c15_i32_72 = arith.constant 15 : i32
      %256 = tpu.dynamic_rotate %247 by %c15_i32_72 dim 0 : vector<16x128xf32>, i32 -> vector<16x128xf32>
      %257 = arith.subf %256, %247 : vector<16x128xf32>
      %258 = arith.mulf %29, %257 : vector<16x128xf32>
      %259 = arith.addf %240, %258 : vector<16x128xf32>
      %cst_73 = arith.constant -5.000000e-02 : f32
      %cst_74 = arith.constant 5.000000e-02 : f32
      %260 = vector.broadcast %cst_73 : f32 to vector<16x128xf32>
      %261 = arith.maximumf %260, %259 : vector<16x128xf32>
      %262 = vector.broadcast %cst_74 : f32 to vector<16x128xf32>
      %263 = arith.minimumf %262, %261 : vector<16x128xf32>
      %264 = arith.index_cast %241 : i32 to index
      %265 = memref.load %arg1[%264] : memref<1000xf32, #tpu.memory_space<smem>>
      %266 = arith.subf %255, %222 : vector<16x128xf32>
      %267 = vector.broadcast %265 : f32 to vector<16x128xf32>
      %268 = arith.mulf %267, %266 : vector<16x128xf32>
      %269 = arith.addf %255, %268 : vector<16x128xf32>
      %270 = arith.subf %263, %230 : vector<16x128xf32>
      %271 = vector.broadcast %265 : f32 to vector<16x128xf32>
      %272 = arith.mulf %271, %270 : vector<16x128xf32>
      %273 = arith.addf %263, %272 : vector<16x128xf32>
      %c7_i32 = arith.constant 7 : i32
      %274 = arith.addi %42, %c7_i32 : i32
      %c1_i32_75 = arith.constant 1 : i32
      %275 = tpu.dynamic_rotate %269 by %c1_i32_75 dim 1 : vector<16x128xf32>, i32 -> vector<16x128xf32>
      %276 = arith.subf %275, %269 : vector<16x128xf32>
      %c1_i32_76 = arith.constant 1 : i32
      %277 = tpu.dynamic_rotate %273 by %c1_i32_76 dim 0 : vector<16x128xf32>, i32 -> vector<16x128xf32>
      %278 = arith.subf %277, %273 : vector<16x128xf32>
      %279 = arith.addf %276, %278 : vector<16x128xf32>
      %280 = arith.subf %1, %279 : vector<16x128xf32>
      %c127_i32_77 = arith.constant 127 : i32
      %281 = tpu.dynamic_rotate %280 by %c127_i32_77 dim 1 : vector<16x128xf32>, i32 -> vector<16x128xf32>
      %282 = arith.subf %281, %280 : vector<16x128xf32>
      %283 = arith.mulf %8, %282 : vector<16x128xf32>
      %284 = arith.addf %269, %283 : vector<16x128xf32>
      %cst_78 = arith.constant -5.000000e-02 : f32
      %cst_79 = arith.constant 5.000000e-02 : f32
      %285 = vector.broadcast %cst_78 : f32 to vector<16x128xf32>
      %286 = arith.maximumf %285, %284 : vector<16x128xf32>
      %287 = vector.broadcast %cst_79 : f32 to vector<16x128xf32>
      %288 = arith.minimumf %287, %286 : vector<16x128xf32>
      %c15_i32_80 = arith.constant 15 : i32
      %289 = tpu.dynamic_rotate %280 by %c15_i32_80 dim 0 : vector<16x128xf32>, i32 -> vector<16x128xf32>
      %290 = arith.subf %289, %280 : vector<16x128xf32>
      %291 = arith.mulf %29, %290 : vector<16x128xf32>
      %292 = arith.addf %273, %291 : vector<16x128xf32>
      %cst_81 = arith.constant -5.000000e-02 : f32
      %cst_82 = arith.constant 5.000000e-02 : f32
      %293 = vector.broadcast %cst_81 : f32 to vector<16x128xf32>
      %294 = arith.maximumf %293, %292 : vector<16x128xf32>
      %295 = vector.broadcast %cst_82 : f32 to vector<16x128xf32>
      %296 = arith.minimumf %295, %294 : vector<16x128xf32>
      %297 = arith.index_cast %274 : i32 to index
      %298 = memref.load %arg1[%297] : memref<1000xf32, #tpu.memory_space<smem>>
      %299 = arith.subf %288, %255 : vector<16x128xf32>
      %300 = vector.broadcast %298 : f32 to vector<16x128xf32>
      %301 = arith.mulf %300, %299 : vector<16x128xf32>
      %302 = arith.addf %288, %301 : vector<16x128xf32>
      %303 = arith.subf %296, %263 : vector<16x128xf32>
      %304 = vector.broadcast %298 : f32 to vector<16x128xf32>
      %305 = arith.mulf %304, %303 : vector<16x128xf32>
      %306 = arith.addf %296, %305 : vector<16x128xf32>
      scf.yield %288, %296, %302, %306 : vector<16x128xf32>, vector<16x128xf32>, vector<16x128xf32>, vector<16x128xf32>
    }
    %c125_i32_11 = arith.constant 125 : i32
    %c1_i32_12 = arith.constant 1 : i32
    %33 = tpu.dynamic_rotate %32#0 by %c1_i32_12 dim 1 : vector<16x128xf32>, i32 -> vector<16x128xf32>
    %34 = arith.subf %33, %32#0 : vector<16x128xf32>
    %c1_i32_13 = arith.constant 1 : i32
    %35 = tpu.dynamic_rotate %32#1 by %c1_i32_13 dim 0 : vector<16x128xf32>, i32 -> vector<16x128xf32>
    %36 = arith.subf %35, %32#1 : vector<16x128xf32>
    %37 = arith.addf %34, %36 : vector<16x128xf32>
    %38 = arith.subf %1, %37 : vector<16x128xf32>
    %c0_14 = arith.constant 0 : index
    %c0_15 = arith.constant 0 : index
    %c0_16 = arith.constant 0 : index
    %39 = vector.load %arg3[%c0_14, %c0_15, %c0_16] : memref<1x16x128xf32, #tpu.memory_space<vmem>>, vector<1x16x128xf32>
    %40 = vector.shape_cast %39 : vector<1x16x128xf32> to vector<16x128xf32>
    %41 = vector.shape_cast %38 : vector<16x128xf32> to vector<1x16x128xf32>
    tpu.vector_store %arg3[%c0_14, %c0_15, %c0_16], %41 {strides = array<i32>} : memref<1x16x128xf32, #tpu.memory_space<vmem>>, vector<1x16x128xf32>,
    return
  }
  func.func @transform_0(%arg0: i32) -> i32 {
    %c0_i32 = arith.constant 0 : i32
    %c0_i32_0 = arith.constant 0 : i32
    return %c0_i32 : i32
  }
  func.func @transform_1(%arg0: i32) -> (i32, i32, i32) {
    %c0_i32 = arith.constant 0 : i32
    %c0_i32_0 = arith.constant 0 : i32
    %c0_i32_1 = arith.constant 0 : i32
    return %arg0, %c0_i32, %c0_i32_0 : i32, i32, i32
  }
  func.func @transform_2(%arg0: i32) -> (i32, i32, i32) {
    %c0_i32 = arith.constant 0 : i32
    %c0_i32_0 = arith.constant 0 : i32
    %c0_i32_1 = arith.constant 0 : i32
    return %arg0, %c0_i32, %c0_i32_0 : i32, i32, i32
  }
}

</mosaic_0001>

<bundles_post_ra>
// kernel: tpu_custom_call.1
= control target key start
LH: loop header
LB: loop body
LE: loop exit
PB: predicated region body
PF: predicated region fallthrough
CT: control target
= control target key end

     0   :  { %7 = vsyncpa [#allocation5], 0  ;;  %s1185_s0 = inlined_call_operand.hbm [shape: f32[1000], index: 0, kind: input, shape index: {}]   ;;  %s1186_s1 = inlined_call_operand.hbm [shape: f32[1,16,128], index: 1, kind: input, shape index: {}]   ;;  %s1187_s2 = inlined_call_operand.hbm [shape: f32[1,16,128], index: 2, kind: output, shape index: {}]  }
   0x1   :  { %8 = vsyncpa [#allocation3], 0 }
   0x2   :  { %9 = vsyncpa [#allocation4], 0  ;;  %s742_s11 = scalar_lea.hbm %s1185_s0, 128 }
   0x3   :  { %p743_p0 = scmp.ne.s32.totalorder %s1185_s0, %s742_s11  ;;  %p746_p1 = scmp.lt.u32.totalorder %s742_s11, %s1185_s0 }
   0x5   :  { %p748_p2 = pnand %p746_p1, %p743_p0 }
   0x7   :  { %751 = shalt.err (!%p748_p2)
}
   0x8   :  { %s874_s16 = smov [#allocation2]   ;;  %s875_s19 = smov [#allocation6]  }
   0x9   :  { %17 = dma.hbm_to_smem %s1185_s0, 128, %s874_s16, [#allocation5]  }
   0xa   :  { %s23_s20 = sshll.u32 %s875_s19, 4  ;;  %s752_s23 = scalar_lea.hbm %s1186_s1, 256  ;;  %s24_s20 = int_to_ptr.vmem [resolvable:$true] %s23_s20 }
   0xb   :  { %p753_p3 = scmp.ne.s32.totalorder %s1186_s1, %s752_s23  ;;  %p756_p4 = scmp.lt.u32.totalorder %s752_s23, %s1186_s1 }
   0xd   :  { %p758_p5 = pnand %p756_p4, %p753_p3 }
   0xf   :  { %761 = shalt.err (!%p758_p5)
}
  0x10   :  { %s762_s28 = scalar_lea.vmem %s24_s20, 256  ;;  %p767_p7 = scmp.lt.s32.totalorder %s24_s20, %s24_s20 }
  0x11   :  { %p763_p6 = scmp.ne.s32.totalorder %s24_s20, %s762_s28  ;;  %p768_p8 = scmp.lt.s32.totalorder %s762_s28, %s762_s28 }
  0x13   :  { %p769_p9 = por %p768_p8, %p767_p7 }
  0x15   :  { %p770_p10 = pnand %p769_p9, %p763_p6 }
  0x17   :  { %773 = shalt.err (!%p770_p10)
}
  0x18   :  { %s876_s0 = smov 128   ;;  %s877_s29 = smov 8  }
  0x19   :  { %29 = dma.hbm_to_vmem [thread:$0]  %s1186_s1, 256, %s24_s20, [#allocation3], %s876_s0, %s876_s0, %s877_s29  }
  0x1a   :  { %832 = dma.done.wait [#allocation5], 128  }
  0x1b   :  { %833 = vsyncadd [#allocation5], 4294967168 }
  0x1c   :  { %834 = dma.done.wait [#allocation3], 256  }
  0x1d   :  { %835 = vsyncadd [#allocation3], 4294967040 }
  0x1e   :  { %36 = sfence }
  0x1f   :  { %v925_v0 = vld [vmem:[#allocation6] sm:$0xff]  ;;  %v927_v1 = vld [vmem:[#allocation6 + $0x8] sm:$0xff]  ;;  %v39_v2 = vlaneseq  ;;  %v878_v6 = vmov 0.0   ;;  %v936_v10 = vmov 0.0   ;;  %v938_v11 = vmov 0.0   ;;  %s952_s1 = smov 0  }
  0x20   :  { %v940_v12 = vmov 0.0   ;;  %v942_v13 = vmov 0.0   ;;  %v944_v14 = vmov 0.0   ;;  %v946_v15 = vmov 0.0  }
  0x21   :  { %v40_v3 = vand.u32 127, %v39_v2  ;;  %v929_v4 = vshrl.u32 %v39_v2, 7  ;;  %v948_v16 = vmov 0.0   ;;  %v950_v17 = vmov 0.0  }
  0x23   :  { %v43_v5 = vadd.s32 8, %v929_v4  ;;  %vm44_vm0 = vcmp.lt.s32.totalorder %v40_v3, 127 }
  0x24   :  { %v932_v7 = vsel %vm44_vm0, 0.125, %v878_v6 }
  0x25   :  { %v57_v8 = vand.u32 15, %v43_v5 }
  0x27   :  { %vm71_vm1 = vcmp.lt.s32.totalorder %v57_v8, 15 }
  0x28   :  { %v934_v9 = vsel %vm71_vm1, 0.125, %v878_v6 }
  0x29 LB: > { %s879_s4 = smov 1   ;;  %v95_v18 = vrot.slane %v844_v11, 7  ;;  %v96_v19 = vrot.slane %v840_v10, 7  ;;  %vm97_vm2 = vcmp.lt.s32.totalorder %v929_v4, 1  ;;  %s880_s5 = smov 127   ;;  %vm122_vm3 = vcmp.lt.s32.totalorder %v929_v4, 7  ;;  %s872_s1 = sphi %s952_s1, %s79_s1   ;;  %v868_v17 = vphi %v950_v17, %v1191_v17   ;;  %v864_v16 = vphi %v948_v16, %v1190_v16   ;;  %v860_v15 = vphi %v946_v15, %v1189_v15   ;;  %v856_v14 = vphi %v944_v14, %v1188_v14   ;;  %v852_v13 = vphi %v942_v13, %v554_v13   ;;  %v848_v12 = vphi %v940_v12, %v555_v12   ;;  %v844_v11 = vphi %v938_v11, %v560_v11   ;;  %v840_v10 = vphi %v936_v10, %v561_v10  }
  0x2a   : > { %89 = vrot.lane.b32.xlu0 %v852_v13, %s879_s4  ;;  %s981_s6 = sshll.u32 %s872_s1, 3  ;;  %s79_s1 = sadd.s32 1, %s872_s1  }
  0x2b   : > { %v99_v20 = vsel %vm97_vm2, %v96_v19, %v95_v18  ;;  %v98_v23 = vsel %vm97_vm2, %v95_v18, %v96_v19  ;;  %s135_s7 = sld [smem:[#allocation2 + %s981_s6]]  ;;  %s149_s8 = sadd.s32 1, %s981_s6 }
  0x2c   : > { %v100_v21 = vsub.f32 %v99_v20, %v844_v11  ;;  %v101_v26 = vsub.f32 %v98_v23, %v840_v10  ;;  %s194_s9 = sld [smem:[#allocation2 + %s149_s8]]  ;;  %s208_s10 = sadd.s32 2, %s981_s6 }
  0x2d   : > { %s253_s11 = sld [smem:[#allocation2 + %s208_s10]]  ;;  %s267_s12 = sadd.s32 3, %s981_s6 }
  0x2e   : > { %91 = vrot.lane.b32.xlu0 %v848_v12, %s879_s4  ;;  %s312_s13 = sld [smem:[#allocation2 + %s267_s12]]  ;;  %s326_s14 = sadd.s32 4, %s981_s6 }
  0x2f   : > { %s371_s15 = sld [smem:[#allocation2 + %s326_s14]]  ;;  %s385_s16 = sadd.s32 5, %s981_s6 }
  0x30   : > { %s430_s17 = sld [smem:[#allocation2 + %s385_s16]]  ;;  %s444_s18 = sadd.s32 6, %s981_s6 }
  0x31   : > { %v138_v42 = vstv %s135_s7  ;;  %s489_s19 = sld [smem:[#allocation2 + %s444_s18]]  ;;  %s503_s20 = sadd.s32 7, %s981_s6 }
  0x32   : > { %s548_s21 = sld [smem:[#allocation2 + %s503_s20]]  ;;  %p76_p11 = scmp.ge.s32.totalorder %s79_s1, 125  }
  0x33   :  { %s881_s22 = smov (%p76_p11), 1   ;;  %s882_s23 = smov (%p76_p11), [#allocation7]  }
  0x34   :  { %s586_s24 = sshll.u32 (%p76_p11), %s882_s23, 4  ;;  %s587_s24 = int_to_ptr.vmem [resolvable:$true] %s586_s24 }
  0x35   :  { %s774_s25 = scalar_lea.vmem (%p76_p11), %s587_s24, 256  ;;  %p779_p13 = scmp.lt.s32.totalorder (%p76_p11), %s587_s24, %s587_s24 }
  0x36   :  { %p775_p12 = scmp.ne.s32.totalorder (%p76_p11), %s587_s24, %s774_s25  ;;  %p780_p0 = scmp.lt.s32.totalorder (%p76_p11), %s774_s25, %s774_s25 }
  0x38   :  { %p781_p1 = por (%p76_p11), %p780_p0, %p779_p13 }
  0x3a   :  { %p782_p2 = pnand (%p76_p11), %p781_p1, %p775_p12 }
  0x9c   : > { %v90_v22 = vpop.permute.xlu0 %89 }
  0x9d   : > { %v93_v24 = vsub.f32 %v90_v22, %v852_v13 }
  0x9f   : > { %v102_v25 = vadd.f32 %v100_v21, %v93_v24 }
  0xa0   : > { %v92_v27 = vpop.permute.xlu0 %91 }
  0xa1   : > { %v104_v28 = vsub.f32 %v925_v0, %v102_v25  ;;  %v94_v29 = vsub.f32 %v92_v27, %v848_v12 }
  0xa3   : > { %v103_v30 = vadd.f32 %v101_v26, %v94_v29  ;;  %106 = vrot.lane.b32.xlu1 %v104_v28, %s880_s5  ;;  %v120_v50 = vrot.slane %v104_v28, 1 }
  0xa5   : > { %v105_v31 = vsub.f32 %v927_v1, %v103_v30 }
  0xa7   : > { %108 = vrot.lane.b32.xlu1 %v105_v31, %s880_s5  ;;  %v121_v49 = vrot.slane %v105_v31, 1 }
  0xa9   : > { %v123_v51 = vsel %vm122_vm3, %v120_v50, %v121_v49  ;;  %v124_v52 = vsel %vm122_vm3, %v121_v49, %v120_v50 }
  0xaa   : > { %v126_v53 = vsub.f32 %v124_v52, %v105_v31  ;;  %v125_v54 = vsub.f32 %v123_v51, %v104_v28 }
  0xac   : > { %v128_v55 = vmul.f32 %v126_v53, %v934_v9  ;;  %v127_v56 = vmul.f32 0.125, %v125_v54 }
  0xae   : > { %v130_v57 = vadd.f32 %v840_v10, %v128_v55  ;;  %v129_v58 = vadd.f32 %v844_v11, %v127_v56 }
  0xb0   : > { %v632_v59 = vclamps-f32 %v130_v57, 0.05  ;;  %v631_v60 = vclamps-f32 %v129_v58, 0.05 }
  0xb2   : > { %v144_v61 = vsub.f32 %v632_v59, %v856_v14  ;;  %v143_v62 = vsub.f32 %v631_v60, %v860_v15 }
  0xb4   : > { %v146_v63 = vmul.f32 %v144_v61, %v138_v42  ;;  %v145_v2 = vmul.f32 %v143_v62, %v138_v42 }
  0xb6   : > { %v147_v3 = vadd.f32 %v631_v60, %v145_v2  ;;  %v148_v5 = vadd.f32 %v632_v59, %v146_v63 }
  0xb8   : > { %v156_v6 = vrot.slane %v147_v3, 7  ;;  %v157_v8 = vrot.slane %v148_v5, 7 }
  0xba   : > { %v158_v11 = vsel %vm97_vm2, %v156_v6, %v157_v8 }
  0xbb   : > { %v161_v19 = vsub.f32 %v158_v11, %v148_v5 }
 0x115   : > { %v107_v32 = vpop.permute.xlu1 %106 }
 0x116   : > { %v110_v33 = vsub.f32 %v107_v32, %v104_v28  ;;  %v197_v32 = vstv %s194_s9 }
 0x118   : > { %v112_v34 = vmul.f32 %v110_v33, %v932_v7 }
 0x119   : > { %v109_v35 = vpop.permute.xlu1 %108 }
 0x11a   : > { %v114_v36 = vadd.f32 %v852_v13, %v112_v34  ;;  %v111_v37 = vsub.f32 %v109_v35, %v105_v31 }
 0x11c   : > { %v985_v38 = vclamps-f32 %v114_v36, 0.05  ;;  %v113_v39 = vmul.f32 %v111_v37, %v932_v7 }
 0x11e   : > { %v115_v40 = vadd.f32 %v848_v12, %v113_v39  ;;  %v136_v41 = vsub.f32 %v985_v38, %v868_v17  ;;  %v159_v12 = vsel %vm97_vm2, %v157_v8, %v156_v6 }
 0x11f   : > { %v160_v10 = vsub.f32 %v159_v12, %v147_v3 }
 0x120   : > { %v630_v43 = vclamps-f32 %v115_v40, 0.05  ;;  %v139_v44 = vmul.f32 %v138_v42, %v136_v41 }
 0x122   : > { %v141_v45 = vadd.f32 %v985_v38, %v139_v44  ;;  %v137_v46 = vsub.f32 %v630_v43, %v864_v16 }
 0x124   : > { %150 = vrot.lane.b32.xlu0 %v141_v45, %s879_s4  ;;  %v140_v47 = vmul.f32 %v138_v42, %v137_v46 }
 0x126   : > { %v142_v48 = vadd.f32 %v630_v43, %v140_v47 }
 0x128   : > { %152 = vrot.lane.b32.xlu1 %v142_v48, %s879_s4 }
 0x196   : > { %v151_v13 = vpop.permute.xlu0 %150 }
 0x197   : > { %v154_v16 = vsub.f32 %v151_v13, %v141_v45 }
 0x199   : > { %v162_v17 = vadd.f32 %v160_v10, %v154_v16 }
 0x19a   : > { %v153_v14 = vpop.permute.xlu1 %152 }
 0x19b   : > { %v164_v15 = vsub.f32 %v925_v0, %v162_v17  ;;  %v155_v18 = vsub.f32 %v153_v14, %v142_v48 }
 0x19d   : > { %v163_v20 = vadd.f32 %v161_v19, %v155_v18  ;;  %166 = vrot.lane.b32.xlu0 %v164_v15, %s880_s5  ;;  %v180_v41 = vrot.slane %v164_v15, 1 }
 0x19f   : > { %v165_v21 = vsub.f32 %v927_v1, %v163_v20 }
 0x1a1   : > { %168 = vrot.lane.b32.xlu1 %v165_v21, %s880_s5  ;;  %v181_v40 = vrot.slane %v165_v21, 1 }
 0x1a3   : > { %v182_v42 = vsel %vm122_vm3, %v180_v41, %v181_v40  ;;  %v183_v44 = vsel %vm122_vm3, %v181_v40, %v180_v41 }
 0x20f   : > { %v167_v22 = vpop.permute.xlu0 %166 }
 0x210   : > { %v170_v23 = vsub.f32 %v167_v22, %v164_v15  ;;  %v256_v22 = vstv %s253_s11 }
 0x212   : > { %v172_v24 = vmul.f32 %v170_v23, %v932_v7 }
 0x213   : > { %v169_v25 = vpop.permute.xlu1 %168 }
 0x214   : > { %v174_v26 = vadd.f32 %v172_v24, %v141_v45  ;;  %v171_v27 = vsub.f32 %v169_v25, %v165_v21  ;;  %v184_v45 = vsub.f32 %v182_v42, %v164_v15 }
 0x216   : > { %v633_v28 = vclamps-f32 %v174_v26, 0.05  ;;  %v173_v29 = vmul.f32 %v171_v27, %v932_v7  ;;  %v186_v47 = vmul.f32 0.125, %v184_v45 }
 0x218   : > { %v175_v30 = vadd.f32 %v173_v29, %v142_v48  ;;  %v195_v31 = vsub.f32 %v633_v28, %v985_v38  ;;  %v185_v38 = vsub.f32 %v183_v44, %v165_v21  ;;  %v188_v48 = vadd.f32 %v186_v47, %v147_v3 }
 0x21a   : > { %v634_v33 = vclamps-f32 %v175_v30, 0.05  ;;  %v198_v34 = vmul.f32 %v197_v32, %v195_v31  ;;  %v187_v46 = vmul.f32 %v185_v38, %v934_v9  ;;  %v635_v50 = vclamps-f32 %v188_v48, 0.05 }
 0x21c   : > { %v200_v35 = vadd.f32 %v633_v28, %v198_v34  ;;  %v196_v36 = vsub.f32 %v634_v33, %v630_v43  ;;  %v189_v43 = vadd.f32 %v187_v46, %v148_v5  ;;  %v202_v52 = vsub.f32 %v635_v50, %v631_v60 }
 0x21e   : > { %209 = vrot.lane.b32.xlu0 %v200_v35, %s879_s4  ;;  %v199_v37 = vmul.f32 %v197_v32, %v196_v36  ;;  %v636_v49 = vclamps-f32 %v189_v43, 0.05  ;;  %v204_v54 = vmul.f32 %v202_v52, %v197_v32 }
 0x220   : > { %v201_v39 = vadd.f32 %v634_v33, %v199_v37  ;;  %v203_v51 = vsub.f32 %v636_v49, %v632_v59  ;;  %v206_v55 = vadd.f32 %v635_v50, %v204_v54 }
 0x222   : > { %211 = vrot.lane.b32.xlu1 %v201_v39, %s879_s4  ;;  %v205_v53 = vmul.f32 %v203_v51, %v197_v32  ;;  %v215_v57 = vrot.slane %v206_v55, 7 }
 0x224   : > { %v207_v56 = vadd.f32 %v636_v49, %v205_v53 }
 0x226   : > { %v216_v58 = vrot.slane %v207_v56, 7 }
 0x228   : > { %v218_v61 = vsel %vm97_vm2, %v216_v58, %v215_v57  ;;  %v217_v3 = vsel %vm97_vm2, %v215_v57, %v216_v58 }
 0x229   : > { %v219_v2 = vsub.f32 %v218_v61, %v206_v55  ;;  %v220_v8 = vsub.f32 %v217_v3, %v207_v56 }
 0x290   : > { %v210_v62 = vpop.permute.xlu0 %209 }
 0x291   : > { %v213_v63 = vsub.f32 %v210_v62, %v200_v35 }
 0x293   : > { %v221_v5 = vadd.f32 %v219_v2, %v213_v63 }
 0x294   : > { %v212_v6 = vpop.permute.xlu1 %211 }
 0x295   : > { %v223_v59 = vsub.f32 %v925_v0, %v221_v5  ;;  %v214_v60 = vsub.f32 %v212_v6, %v201_v39 }
 0x297   : > { %v222_v12 = vadd.f32 %v220_v8, %v214_v60  ;;  %225 = vrot.lane.b32.xlu0 %v223_v59, %s880_s5  ;;  %v239_v31 = vrot.slane %v223_v59, 1 }
 0x299   : > { %v224_v13 = vsub.f32 %v927_v1, %v222_v12 }
 0x29b   : > { %227 = vrot.lane.b32.xlu1 %v224_v13, %s880_s5  ;;  %v240_v30 = vrot.slane %v224_v13, 1 }
 0x29d   : > { %v241_v32 = vsel %vm122_vm3, %v239_v31, %v240_v30  ;;  %v242_v34 = vsel %vm122_vm3, %v240_v30, %v239_v31 }
 0x309   : > { %v226_v16 = vpop.permute.xlu0 %225 }
 0x30a   : > { %v229_v10 = vsub.f32 %v226_v16, %v223_v59  ;;  %v315_v16 = vstv %s312_s13 }
 0x30c   : > { %v231_v11 = vmul.f32 %v229_v10, %v932_v7 }
 0x30d   : > { %v228_v17 = vpop.permute.xlu1 %227 }
 0x30e   : > { %v233_v14 = vadd.f32 %v231_v11, %v200_v35  ;;  %v230_v15 = vsub.f32 %v228_v17, %v224_v13  ;;  %v243_v35 = vsub.f32 %v241_v32, %v223_v59 }
 0x310   : > { %v637_v18 = vclamps-f32 %v233_v14, 0.05  ;;  %v232_v19 = vmul.f32 %v230_v15, %v932_v7  ;;  %v245_v37 = vmul.f32 0.125, %v243_v35 }
 0x312   : > { %v234_v20 = vadd.f32 %v232_v19, %v201_v39  ;;  %v254_v21 = vsub.f32 %v637_v18, %v633_v28  ;;  %v244_v28 = vsub.f32 %v242_v34, %v224_v13  ;;  %v247_v39 = vadd.f32 %v245_v37, %v206_v55 }
 0x314   : > { %v638_v23 = vclamps-f32 %v234_v20, 0.05  ;;  %v257_v24 = vmul.f32 %v256_v22, %v254_v21  ;;  %v246_v36 = vmul.f32 %v244_v28, %v934_v9  ;;  %v639_v41 = vclamps-f32 %v247_v39, 0.05 }
 0x316   : > { %v259_v25 = vadd.f32 %v637_v18, %v257_v24  ;;  %v255_v26 = vsub.f32 %v638_v23, %v634_v33  ;;  %v248_v33 = vadd.f32 %v246_v36, %v207_v56  ;;  %v261_v44 = vsub.f32 %v639_v41, %v635_v50 }
 0x318   : > { %268 = vrot.lane.b32.xlu0 %v259_v25, %s879_s4  ;;  %v258_v27 = vmul.f32 %v256_v22, %v255_v26  ;;  %v640_v40 = vclamps-f32 %v248_v33, 0.05  ;;  %v263_v45 = vmul.f32 %v261_v44, %v256_v22 }
 0x31a   : > { %v260_v29 = vadd.f32 %v638_v23, %v258_v27  ;;  %v262_v42 = vsub.f32 %v640_v40, %v636_v49  ;;  %v265_v46 = vadd.f32 %v639_v41, %v263_v45 }
 0x31c   : > { %270 = vrot.lane.b32.xlu1 %v260_v29, %s879_s4  ;;  %v264_v38 = vmul.f32 %v262_v42, %v256_v22  ;;  %v274_v43 = vrot.slane %v265_v46, 7 }
 0x31e   : > { %v266_v47 = vadd.f32 %v640_v40, %v264_v38 }
 0x320   : > { %v275_v48 = vrot.slane %v266_v47, 7 }
 0x322   : > { %v277_v51 = vsel %vm97_vm2, %v275_v48, %v274_v43  ;;  %v276_v55 = vsel %vm97_vm2, %v274_v43, %v275_v48 }
 0x323   : > { %v278_v54 = vsub.f32 %v277_v51, %v265_v46  ;;  %v279_v58 = vsub.f32 %v276_v55, %v266_v47 }
 0x38a   : > { %v269_v52 = vpop.permute.xlu0 %268 }
 0x38b   : > { %v272_v53 = vsub.f32 %v269_v52, %v259_v25 }
 0x38d   : > { %v280_v56 = vadd.f32 %v278_v54, %v272_v53 }
 0x38e   : > { %v271_v57 = vpop.permute.xlu1 %270 }
 0x38f   : > { %v282_v49 = vsub.f32 %v925_v0, %v280_v56  ;;  %v273_v50 = vsub.f32 %v271_v57, %v260_v29 }
 0x391   : > { %v281_v61 = vadd.f32 %v279_v58, %v273_v50  ;;  %284 = vrot.lane.b32.xlu0 %v282_v49, %s880_s5  ;;  %v298_v21 = vrot.slane %v282_v49, 1 }
 0x393   : > { %v283_v62 = vsub.f32 %v927_v1, %v281_v61 }
 0x395   : > { %286 = vrot.lane.b32.xlu1 %v283_v62, %s880_s5  ;;  %v299_v20 = vrot.slane %v283_v62, 1 }
 0x397   : > { %v300_v22 = vsel %vm122_vm3, %v298_v21, %v299_v20  ;;  %v301_v24 = vsel %vm122_vm3, %v299_v20, %v298_v21 }
 0x403   : > { %v285_v63 = vpop.permute.xlu0 %284 }
 0x404   : > { %v288_v2 = vsub.f32 %v285_v63, %v282_v49  ;;  %v374_v63 = vstv %s371_s15 }
 0x406   : > { %v290_v3 = vmul.f32 %v288_v2, %v932_v7 }
 0x407   : > { %v287_v5 = vpop.permute.xlu1 %286 }
 0x408   : > { %v292_v6 = vadd.f32 %v290_v3, %v259_v25  ;;  %v289_v59 = vsub.f32 %v287_v5, %v283_v62  ;;  %v302_v25 = vsub.f32 %v300_v22, %v282_v49 }
 0x40a   : > { %v641_v60 = vclamps-f32 %v292_v6, 0.05  ;;  %v291_v8 = vmul.f32 %v289_v59, %v932_v7  ;;  %v304_v27 = vmul.f32 0.125, %v302_v25 }
 0x40c   : > { %v293_v12 = vadd.f32 %v291_v8, %v260_v29  ;;  %v313_v13 = vsub.f32 %v641_v60, %v637_v18  ;;  %v303_v18 = vsub.f32 %v301_v24, %v283_v62  ;;  %v306_v29 = vadd.f32 %v304_v27, %v265_v46 }
 0x40e   : > { %v642_v10 = vclamps-f32 %v293_v12, 0.05  ;;  %v316_v11 = vmul.f32 %v315_v16, %v313_v13  ;;  %v305_v26 = vmul.f32 %v303_v18, %v934_v9  ;;  %v643_v31 = vclamps-f32 %v306_v29, 0.05 }
 0x410   : > { %v318_v17 = vadd.f32 %v641_v60, %v316_v11  ;;  %v314_v14 = vsub.f32 %v642_v10, %v638_v23  ;;  %v307_v23 = vadd.f32 %v305_v26, %v266_v47  ;;  %v320_v34 = vsub.f32 %v643_v31, %v639_v41 }
 0x412   : > { %327 = vrot.lane.b32.xlu0 %v318_v17, %s879_s4  ;;  %v317_v15 = vmul.f32 %v315_v16, %v314_v14  ;;  %v644_v30 = vclamps-f32 %v307_v23, 0.05  ;;  %v322_v35 = vmul.f32 %v320_v34, %v315_v16 }
 0x414   : > { %v319_v19 = vadd.f32 %v642_v10, %v317_v15  ;;  %v321_v32 = vsub.f32 %v644_v30, %v640_v40  ;;  %v324_v36 = vadd.f32 %v643_v31, %v322_v35 }
 0x416   : > { %329 = vrot.lane.b32.xlu1 %v319_v19, %s879_s4  ;;  %v323_v28 = vmul.f32 %v321_v32, %v315_v16  ;;  %v333_v33 = vrot.slane %v324_v36, 7 }
 0x418   : > { %v325_v37 = vadd.f32 %v644_v30, %v323_v28 }
 0x41a   : > { %v334_v39 = vrot.slane %v325_v37, 7 }
 0x41c   : > { %v336_v42 = vsel %vm97_vm2, %v334_v39, %v333_v33  ;;  %v335_v46 = vsel %vm97_vm2, %v333_v33, %v334_v39 }
 0x41d   : > { %v337_v45 = vsub.f32 %v336_v42, %v324_v36  ;;  %v338_v48 = vsub.f32 %v335_v46, %v325_v37 }
 0x484   : > { %v328_v44 = vpop.permute.xlu0 %327 }
 0x485   : > { %v331_v38 = vsub.f32 %v328_v44, %v318_v17 }
 0x487   : > { %v339_v47 = vadd.f32 %v337_v45, %v331_v38 }
 0x488   : > { %v330_v43 = vpop.permute.xlu1 %329 }
 0x489   : > { %v341_v40 = vsub.f32 %v925_v0, %v339_v47  ;;  %v332_v41 = vsub.f32 %v330_v43, %v319_v19 }
 0x48b   : > { %v340_v51 = vadd.f32 %v338_v48, %v332_v41  ;;  %343 = vrot.lane.b32.xlu0 %v341_v40, %s880_s5  ;;  %v357_v13 = vrot.slane %v341_v40, 1 }
 0x48d   : > { %v342_v52 = vsub.f32 %v927_v1, %v340_v51 }
 0x48f   : > { %345 = vrot.lane.b32.xlu1 %v342_v52, %s880_s5  ;;  %v358_v12 = vrot.slane %v342_v52, 1 }
 0x491   : > { %v359_v16 = vsel %vm122_vm3, %v357_v13, %v358_v12  ;;  %v360_v11 = vsel %vm122_vm3, %v358_v12, %v357_v13 }
 0x4fd   : > { %v344_v53 = vpop.permute.xlu0 %343 }
 0x4fe   : > { %v347_v54 = vsub.f32 %v344_v53, %v341_v40  ;;  %v433_v53 = vstv %s430_s17 }
 0x500   : > { %v349_v55 = vmul.f32 %v347_v54, %v932_v7 }
 0x501   : > { %v346_v56 = vpop.permute.xlu1 %345 }
 0x502   : > { %v351_v57 = vadd.f32 %v349_v55, %v318_v17  ;;  %v348_v49 = vsub.f32 %v346_v56, %v342_v52  ;;  %v361_v17 = vsub.f32 %v359_v16, %v341_v40 }
 0x504   : > { %v645_v50 = vclamps-f32 %v351_v57, 0.05  ;;  %v350_v58 = vmul.f32 %v348_v49, %v932_v7  ;;  %v363_v15 = vmul.f32 0.125, %v361_v17 }
 0x506   : > { %v352_v61 = vadd.f32 %v350_v58, %v319_v19  ;;  %v372_v62 = vsub.f32 %v645_v50, %v641_v60  ;;  %v362_v60 = vsub.f32 %v360_v11, %v342_v52  ;;  %v365_v19 = vadd.f32 %v363_v15, %v324_v36 }
 0x508   : > { %v646_v2 = vclamps-f32 %v352_v61, 0.05  ;;  %v375_v3 = vmul.f32 %v374_v63, %v372_v62  ;;  %v364_v14 = vmul.f32 %v362_v60, %v934_v9  ;;  %v647_v21 = vclamps-f32 %v365_v19, 0.05 }
 0x50a   : > { %v377_v5 = vadd.f32 %v645_v50, %v375_v3  ;;  %v373_v6 = vsub.f32 %v646_v2, %v642_v10  ;;  %v366_v10 = vadd.f32 %v364_v14, %v325_v37  ;;  %v379_v24 = vsub.f32 %v647_v21, %v643_v31 }
 0x50c   : > { %386 = vrot.lane.b32.xlu0 %v377_v5, %s879_s4  ;;  %v376_v59 = vmul.f32 %v374_v63, %v373_v6  ;;  %v648_v20 = vclamps-f32 %v366_v10, 0.05  ;;  %v381_v25 = vmul.f32 %v379_v24, %v374_v63 }
 0x50e   : > { %v378_v8 = vadd.f32 %v646_v2, %v376_v59  ;;  %v380_v22 = vsub.f32 %v648_v20, %v644_v30  ;;  %v383_v26 = vadd.f32 %v647_v21, %v381_v25 }
 0x510   : > { %388 = vrot.lane.b32.xlu1 %v378_v8, %s879_s4  ;;  %v382_v18 = vmul.f32 %v380_v22, %v374_v63  ;;  %v392_v23 = vrot.slane %v383_v26, 7 }
 0x512   : > { %v384_v27 = vadd.f32 %v648_v20, %v382_v18 }
 0x514   : > { %v393_v29 = vrot.slane %v384_v27, 7 }
 0x516   : > { %v395_v32 = vsel %vm97_vm2, %v393_v29, %v392_v23  ;;  %v394_v36 = vsel %vm97_vm2, %v392_v23, %v393_v29 }
 0x517   : > { %v396_v35 = vsub.f32 %v395_v32, %v383_v26  ;;  %v397_v39 = vsub.f32 %v394_v36, %v384_v27 }
 0x57e   : > { %v387_v34 = vpop.permute.xlu0 %386 }
 0x57f   : > { %v390_v28 = vsub.f32 %v387_v34, %v377_v5 }
 0x581   : > { %v398_v37 = vadd.f32 %v396_v35, %v390_v28 }
 0x582   : > { %v389_v33 = vpop.permute.xlu1 %388 }
 0x583   : > { %v400_v30 = vsub.f32 %v925_v0, %v398_v37  ;;  %v391_v31 = vsub.f32 %v389_v33, %v378_v8 }
 0x585   : > { %v399_v42 = vadd.f32 %v397_v39, %v391_v31  ;;  %402 = vrot.lane.b32.xlu0 %v400_v30, %s880_s5  ;;  %v416_v62 = vrot.slane %v400_v30, 1 }
 0x587   : > { %v401_v44 = vsub.f32 %v927_v1, %v399_v42 }
 0x589   : > { %404 = vrot.lane.b32.xlu1 %v401_v44, %s880_s5  ;;  %v417_v61 = vrot.slane %v401_v44, 1 }
 0x58b   : > { %v418_v63 = vsel %vm122_vm3, %v416_v62, %v417_v61  ;;  %v419_v3 = vsel %vm122_vm3, %v417_v61, %v416_v62 }
 0x5f7   : > { %v403_v38 = vpop.permute.xlu0 %402 }
 0x5f8   : > { %v406_v45 = vsub.f32 %v403_v38, %v400_v30  ;;  %v492_v38 = vstv %s489_s19 }
 0x5fa   : > { %v408_v46 = vmul.f32 %v406_v45, %v932_v7 }
 0x5fb   : > { %v405_v47 = vpop.permute.xlu1 %404 }
 0x5fc   : > { %v410_v43 = vadd.f32 %v408_v46, %v377_v5  ;;  %v407_v40 = vsub.f32 %v405_v47, %v401_v44  ;;  %v420_v5 = vsub.f32 %v418_v63, %v400_v30 }
 0x5fe   : > { %v649_v41 = vclamps-f32 %v410_v43, 0.05  ;;  %v409_v48 = vmul.f32 %v407_v40, %v932_v7  ;;  %v422_v59 = vmul.f32 0.125, %v420_v5 }
 0x600   : > { %v411_v51 = vadd.f32 %v409_v48, %v378_v8  ;;  %v431_v52 = vsub.f32 %v649_v41, %v645_v50  ;;  %v421_v50 = vsub.f32 %v419_v3, %v401_v44  ;;  %v424_v8 = vadd.f32 %v422_v59, %v383_v26 }
 0x602   : > { %v650_v54 = vclamps-f32 %v411_v51, 0.05  ;;  %v434_v55 = vmul.f32 %v433_v53, %v431_v52  ;;  %v423_v6 = vmul.f32 %v421_v50, %v934_v9  ;;  %v651_v13 = vclamps-f32 %v424_v8, 0.05 }
 0x604   : > { %v436_v56 = vadd.f32 %v649_v41, %v434_v55  ;;  %v432_v57 = vsub.f32 %v650_v54, %v646_v2  ;;  %v425_v2 = vadd.f32 %v423_v6, %v384_v27  ;;  %v438_v11 = vsub.f32 %v651_v13, %v647_v21 }
 0x606   : > { %445 = vrot.lane.b32.xlu0 %v436_v56, %s879_s4  ;;  %v435_v49 = vmul.f32 %v433_v53, %v432_v57  ;;  %v652_v12 = vclamps-f32 %v425_v2, 0.05  ;;  %v440_v17 = vmul.f32 %v438_v11, %v433_v53 }
 0x608   : > { %v437_v58 = vadd.f32 %v650_v54, %v435_v49  ;;  %v439_v16 = vsub.f32 %v652_v12, %v648_v20  ;;  %v442_v14 = vadd.f32 %v651_v13, %v440_v17 }
 0x60a   : > { %447 = vrot.lane.b32.xlu1 %v437_v58, %s879_s4  ;;  %v441_v60 = vmul.f32 %v439_v16, %v433_v53  ;;  %v451_v10 = vrot.slane %v442_v14, 7 }
 0x60c   : > { %v443_v15 = vadd.f32 %v652_v12, %v441_v60 }
 0x60e   : > { %v452_v19 = vrot.slane %v443_v15, 7 }
 0x610   : > { %v454_v22 = vsel %vm97_vm2, %v452_v19, %v451_v10  ;;  %v453_v26 = vsel %vm97_vm2, %v451_v10, %v452_v19 }
 0x611   : > { %v455_v25 = vsub.f32 %v454_v22, %v442_v14  ;;  %v456_v29 = vsub.f32 %v453_v26, %v443_v15 }
 0x678   : > { %v446_v24 = vpop.permute.xlu0 %445 }
 0x679   : > { %v449_v18 = vsub.f32 %v446_v24, %v436_v56 }
 0x67b   : > { %v457_v27 = vadd.f32 %v455_v25, %v449_v18 }
 0x67c   : > { %v448_v23 = vpop.permute.xlu1 %447 }
 0x67d   : > { %v459_v20 = vsub.f32 %v925_v0, %v457_v27  ;;  %v450_v21 = vsub.f32 %v448_v23, %v437_v58 }
 0x67f   : > { %v458_v32 = vadd.f32 %v456_v29, %v450_v21  ;;  %461 = vrot.lane.b32.xlu0 %v459_v20, %s880_s5  ;;  %v475_v51 = vrot.slane %v459_v20, 1 }
 0x681   : > { %v460_v34 = vsub.f32 %v927_v1, %v458_v32 }
 0x683   : > { %463 = vrot.lane.b32.xlu1 %v460_v34, %s880_s5 }
 0x6f1   : > { %v462_v28 = vpop.permute.xlu0 %461 }
 0x6f2   : > { %v465_v35 = vsub.f32 %v462_v28, %v459_v20 }
 0x6f4   : > { %v467_v36 = vmul.f32 %v465_v35, %v932_v7 }
 0x6f5   : > { %v464_v37 = vpop.permute.xlu1 %463 }
 0x6f6   : > { %v469_v33 = vadd.f32 %v467_v36, %v436_v56  ;;  %v466_v30 = vsub.f32 %v464_v37, %v460_v34  ;;  %v551_v36 = vstv %s548_s21 }
 0x6f8   : > { %v1101_v31 = vclamps-f32 %v469_v33, 0.05  ;;  %v468_v39 = vmul.f32 %v466_v30, %v932_v7 }
 0x6fa   : > { %v470_v42 = vadd.f32 %v468_v39, %v437_v58  ;;  %v490_v44 = vsub.f32 %v1101_v31, %v649_v41  ;;  %v476_v41 = vrot.slane %v460_v34, 1 }
 0x6fc   : > { %v1105_v45 = vclamps-f32 %v470_v42, 0.05  ;;  %v493_v46 = vmul.f32 %v492_v38, %v490_v44  ;;  %v477_v52 = vsel %vm122_vm3, %v475_v51, %v476_v41  ;;  %v478_v53 = vsel %vm122_vm3, %v476_v41, %v475_v51 }
 0x6fd   : > { %v480_v55 = vsub.f32 %v478_v53, %v460_v34 }
 0x6fe   : > { %v1108_v47 = vadd.f32 %v1101_v31, %v493_v46  ;;  %v491_v43 = vsub.f32 %v1105_v45, %v650_v54  ;;  %v479_v54 = vsub.f32 %v477_v52, %v459_v20 }
 0x6ff   : > { %v482_v56 = vmul.f32 %v480_v55, %v934_v9 }
 0x700   : > { %504 = vrot.lane.b32.xlu0 %v1108_v47, %s879_s4  ;;  %v494_v40 = vmul.f32 %v492_v38, %v491_v43  ;;  %v481_v57 = vmul.f32 0.125, %v479_v54 }
 0x701   : > { %v484_v49 = vadd.f32 %v482_v56, %v443_v15 }
 0x702   : > { %v1114_v48 = vadd.f32 %v1105_v45, %v494_v40  ;;  %v483_v58 = vadd.f32 %v481_v57, %v442_v14 }
 0x703   : > { %v656_v61 = vclamps-f32 %v484_v49, 0.05 }
 0x704   : > { %506 = vrot.lane.b32.xlu1 %v1114_v48, %s879_s4  ;;  %v655_v62 = vclamps-f32 %v483_v58, 0.05 }
 0x705   : > { %v498_v63 = vsub.f32 %v656_v61, %v652_v12 }
 0x706   : > { %v497_v3 = vsub.f32 %v655_v62, %v651_v13 }
 0x707   : > { %v500_v50 = vmul.f32 %v498_v63, %v492_v38 }
 0x708   : > { %v499_v5 = vmul.f32 %v497_v3, %v492_v38 }
 0x709   : > { %v502_v59 = vadd.f32 %v656_v61, %v500_v50 }
 0x70a   : > { %v501_v6 = vadd.f32 %v655_v62, %v499_v5 }
 0x70b   : > { %v511_v8 = vrot.slane %v502_v59, 7 }
 0x70c   : > { %v510_v2 = vrot.slane %v501_v6, 7 }
 0x70e   : > { %v513_v16 = vsel %vm97_vm2, %v511_v8, %v510_v2  ;;  %v512_v14 = vsel %vm97_vm2, %v510_v2, %v511_v8 }
 0x70f   : > { %v514_v17 = vsub.f32 %v513_v16, %v501_v6  ;;  %v515_v19 = vsub.f32 %v512_v14, %v502_v59 }
 0x772   : > { %v505_v11 = vpop.permute.xlu0 %504 }
 0x773   : > { %v508_v60 = vsub.f32 %v505_v11, %v1108_v47 }
 0x775   : > { %v516_v15 = vadd.f32 %v514_v17, %v508_v60 }
 0x776   : > { %v507_v12 = vpop.permute.xlu1 %506 }
 0x777   : > { %v518_v13 = vsub.f32 %v925_v0, %v516_v15  ;;  %v509_v10 = vsub.f32 %v507_v12, %v1114_v48 }
 0x779   : > { %v517_v22 = vadd.f32 %v515_v19, %v509_v10  ;;  %520 = vrot.lane.b32.xlu0 %v518_v13, %s880_s5  ;;  %v534_v18 = vrot.slane %v518_v13, 1 }
 0x77b   : > { %v519_v24 = vsub.f32 %v927_v1, %v517_v22 }
 0x77d   : > { %v535_v25 = vrot.slane %v519_v24, 1  ;;  %522 = vrot.lane.b32.xlu1 %v519_v24, %s880_s5 }
 0x77f   : > { %v536_v26 = vsel %vm122_vm3, %v534_v18, %v535_v25  ;;  %v537_v27 = vsel %vm122_vm3, %v535_v25, %v534_v18 }
 0x780   : > { %v538_v23 = vsub.f32 %v536_v26, %v518_v13  ;;  %v539_v20 = vsub.f32 %v537_v27, %v519_v24 }
 0x782   : > { %v540_v21 = vmul.f32 0.125, %v538_v23  ;;  %v541_v29 = vmul.f32 %v539_v20, %v934_v9 }
 0x784   : > { %v542_v32 = vadd.f32 %v540_v21, %v501_v6  ;;  %v543_v34 = vadd.f32 %v541_v29, %v502_v59 }
 0x786   : > { %v660_v28 = vclamps-f32 %v543_v34, 0.05   ;;  %v659_v35 = vclamps-f32 %v542_v32, 0.05  }
 0x788   : > { %v557_v37 = vsub.f32 %v660_v28, %v656_v61  ;;  %v556_v33 = vsub.f32 %v659_v35, %v655_v62  ;;  %v1188_v14 = vmov %v660_v28  ;;  %v1189_v15 = vmov %v659_v35 }
 0x78a   : > { %v558_v30 = vmul.f32 %v556_v33, %v551_v36  ;;  %v559_v39 = vmul.f32 %v557_v37, %v551_v36 }
 0x78c   : > { %v560_v11 = vadd.f32 %v659_v35, %v558_v30   ;;  %v561_v10 = vadd.f32 %v660_v28, %v559_v39  }
 0x7eb   : > { %v521_v42 = vpop.permute.xlu0 %520 }
 0x7ec   : > { %v524_v44 = vsub.f32 %v521_v42, %v518_v13 }
 0x7ee   : > { %v526_v38 = vmul.f32 %v524_v44, %v932_v7 }
 0x7ef   : > { %v523_v46 = vpop.permute.xlu1 %522 }
 0x7f0   : > { %v528_v43 = vadd.f32 %v526_v38, %v1108_v47  ;;  %v525_v40 = vsub.f32 %v523_v46, %v519_v24 }
 0x7f2   : > { %v657_v41 = vclamps-f32 %v528_v43, 0.05   ;;  %v527_v51 = vmul.f32 %v525_v40, %v932_v7 }
 0x7f4   : > { %v549_v52 = vsub.f32 %v657_v41, %v1101_v31  ;;  %v529_v53 = vadd.f32 %v527_v51, %v1114_v48  ;;  %v1191_v17 = vmov %v657_v41  ;;  %562 = vrot.lane.b32.xlu0 (%p76_p11), %v657_v41, %s881_s22  ;;  %v568_v31 = vrot.slane (%p76_p11), %v659_v35, 7 }
 0x7f6   : > { %v552_v55 = vmul.f32 %v551_v36, %v549_v52  ;;  %v658_v54 = vclamps-f32 %v529_v53, 0.05   ;;  %78 = sbr.rel (!%p76_p11) target bundleno = 41 (0x29), region = 43 }
 0x7f8   : > { %v554_v13 = vadd.f32 %v657_v41, %v552_v55   ;;  %v550_v56 = vsub.f32 %v658_v54, %v1105_v45  ;;  %v1190_v16 = vmov %v658_v54  ;;  %564 = vrot.lane.b32.xlu0 (%p76_p11), %v658_v54, %s881_s22  ;;  %v569_v45 = vrot.slane (%p76_p11), %v660_v28, 7 }
 0x7fa   : > { %v553_v57 = vmul.f32 %v551_v36, %v550_v56  ;;  %v572_v47 = vsel (%p76_p11), %vm97_vm2, %v569_v45, %v568_v31  ;;  %v571_v58 = vsel (%p76_p11), %vm97_vm2, %v568_v31, %v569_v45 }
 0x7fb   :  { %v573_v48 = vsub.f32 (%p76_p11), %v572_v47, %v659_v35  ;;  %v574_v63 = vsub.f32 (%p76_p11), %v571_v58, %v660_v28 }
 0x7fc   : > { %v555_v12 = vadd.f32 %v658_v54, %v553_v57  }
 0x866   :  { %v563_v49 = vpop.permute.xlu0 %562 }
 0x867   :  { %v566_v61 = vsub.f32 %v563_v49, %v657_v41 }
 0x869   :  { %v575_v62 = vadd.f32 %v573_v48, %v566_v61 }
 0x86a   :  { %v565_v3 = vpop.permute.xlu0 %564 }
 0x86b   :  { %v567_v50 = vsub.f32 %v565_v3, %v658_v54  ;;  %v577_v5 = vsub.f32 %v925_v0, %v575_v62 }
 0x86d   :  { %v576_v7 = vadd.f32 %v574_v63, %v567_v50  ;;  %579 = vst [vmem:[#allocation7] sm:$0xff] %v577_v5 }
 0x86f   :  { %v578_v9 = vsub.f32 %v927_v1, %v576_v7 }
 0x871   :  { %580 = vst [vmem:[#allocation7 + $0x8] sm:$0xff] %v578_v9 }
 0x872   :  { %785 = shalt.err (!%p782_p2)
}
 0x873   :  { %s786_s28 = scalar_lea.hbm %s1187_s2, 256 }
 0x874   :  { %p787_p3 = scmp.ne.s32.totalorder %s1187_s2, %s786_s28  ;;  %p790_p4 = scmp.lt.u32.totalorder %s786_s28, %s1187_s2 }
 0x876   :  { %p792_p5 = pnand %p790_p4, %p787_p3 }
 0x878   :  { %795 = shalt.err (!%p792_p5)
}
 0x879   :  { %592 = dma.vmem_to_hbm [thread:$0]  %s587_s24, 256, %s1187_s2, [#allocation4], %s876_s0, %s876_s0, %s877_s29  }
 0x87a   :  { %836 = dma.done.wait [#allocation4], 256  }
 0x87b   :  { %837 = vsyncadd [#allocation4], 4294967040 }
 0x87c   :  { %596 = vsyncpa [#allocation3], 1 }
 0x87d   :  { %597 = vsyncpa [#allocation4], 1 }
 0x87e   :  { %598 = vsyncpa [#allocation5], 1 }

</bundles_post_ra>
